<compile_context>
chip_gen: v6e
topology: v6e:2x2x1
jax: 0.10.0
libtpu: 0.0.40
codegen_flags: <defaults>
</compile_context>

<pallas_src>
import functools

import jax
import jax.numpy as jnp
from jax import lax
from jax.experimental import pallas as pl
from jax.experimental.pallas import tpu as pltpu

LANE = 128          # pad every feature/class lane dimension to this
ROW_PAD = 16        # per-graph node rows padded to a multiple of this (bf16 sublanes)
NEG_BIG = -1e30     # finite mask value for padded class lanes


# ----------------------------------------------------------------------------
# Fused Pallas kernel (one grid step == one graph):
#   all SAGE layers + mean-pool readout + linear + log_softmax
# ----------------------------------------------------------------------------
def _fused_sage_kernel(a_ref, rdeg_ref, x_ref, p_ref, w_ref, b_ref,
                       wl_ref, bl_ref, o_ref, h_ref, *, num_layers,
                       num_classes):
    # a_ref   : (1, n_max, n_max)   bf16  0/1 adjacency block (exact)
    # rdeg_ref: (1, n_max, 1)       f32   1/deg (0-safe), f32-exact mean norm
    # x_ref   : (1, n_max, 128)     bf16  zero-padded node features
    # p_ref   : (1, n_max, 1)       f32   1/|graph| at valid rows, 0 at padding
    # w_ref   : (L, 256, 128)       bf16  per-layer stacked [Wr; Wn] (padded)
    # b_ref   : (L, 1, 128)         f32   per-layer bias (padded)
    # wl_ref  : (128, 128)          bf16  classifier weight (padded)
    # bl_ref  : (1, 128)            f32   classifier bias (padded)
    # o_ref   : (1, 1, 128)         f32   log-softmax row for this graph
    # h_ref   : (n_max, 128)        bf16  VMEM scratch with node features
    a = a_ref[0]                              # (n_max, n_max) bf16
    rdeg = rdeg_ref[0]                        # (n_max, 1) f32
    h_ref[...] = x_ref[0]                     # bf16 init

    # TODO(synk): at larger num_layers switch to lax.fori_loop(..., unroll=True)
    # with dynamic w_ref[l] indexing to bound vreg live ranges.
    for l in range(num_layers):               # static unroll (L is small)
        hb = h_ref[...]                       # bf16 (n_max, 128)
        # mean aggregation: exact 0/1 matmul, f32 accumulate, f32 1/deg scale
        agg = jnp.dot(a, hb, preferred_element_type=jnp.float32) * rdeg
        w_l = w_ref[l]                        # (256, 128) bf16
        z = (jnp.dot(hb, w_l[:LANE], preferred_element_type=jnp.float32)
             + jnp.dot(agg.astype(jnp.bfloat16), w_l[LANE:],
                       preferred_element_type=jnp.float32)
             + b_ref[l])
        # TODO(synk): exact Block/SAGELayer source not given; assuming ReLU
        # after every SAGE layer (standard benchmark Block(out=True), norm='None').
        h_ref[...] = jnp.maximum(z, 0.0).astype(jnp.bfloat16)

    # Readout: per-graph mean pool (f32 reciprocal-count vector) -> classifier
    # -> masked log-softmax, all f32.
    hf = h_ref[...].astype(jnp.float32)                       # (n_max, 128)
    xg = jnp.sum(hf * p_ref[0], axis=0, keepdims=True)        # (1, 128) f32
    logits = (jnp.dot(xg.astype(jnp.bfloat16), wl_ref[...],
                      preferred_element_type=jnp.float32) + bl_ref[...])
    cls = lax.broadcasted_iota(jnp.int32, logits.shape, 1)
    logits = jnp.where(cls < num_classes, logits, NEG_BIG)    # mask pad classes
    m = jnp.max(logits, axis=-1, keepdims=True)
    lse = m + jnp.log(jnp.sum(jnp.exp(logits - m), axis=-1, keepdims=True))
    o_ref[0] = (logits - lse).astype(o_ref.dtype)


def sagenet_forward_fused(a3, rdeg3, x3, pvec, w_stacked, b_stacked,
                          wl_pad, bl_pad, *, num_layers, num_classes):
    bg, n_max, _ = x3.shape
    c_pad = wl_pad.shape[1]
    nl = w_stacked.shape[0]

    in_specs = [
        pl.BlockSpec((1, n_max, n_max), lambda g: (g, 0, 0)),   # A block
        pl.BlockSpec((1, n_max, 1),     lambda g: (g, 0, 0)),   # 1/deg
        pl.BlockSpec((1, n_max, LANE),  lambda g: (g, 0, 0)),   # node feats
        pl.BlockSpec((1, n_max, 1),     lambda g: (g, 0, 0)),   # pool vector
        pl.BlockSpec((nl, 2 * LANE, LANE), lambda g: (0, 0, 0)),  # [Wr;Wn]
        pl.BlockSpec((nl, 1, LANE),        lambda g: (0, 0, 0)),  # biases
        pl.BlockSpec((LANE, LANE),         lambda g: (0, 0)),     # classifier W
        pl.BlockSpec((1, LANE),            lambda g: (0, 0)),     # classifier b
    ]
    out_specs = pl.BlockSpec((1, 1, c_pad), lambda g: (g, 0, 0))

    nbytes = lambda arr: arr.size * arr.dtype.itemsize
    weight_bytes = (nbytes(w_stacked) + nbytes(b_stacked)
                    + nbytes(wl_pad) + nbytes(bl_pad))
    block_bytes = (n_max * n_max * 2 + n_max * 4 + n_max * LANE * 2
                   + n_max * 4 + c_pad * 4)
    scratch_bytes = n_max * LANE * 2
    needed = 2 * (block_bytes + weight_bytes) + scratch_bytes + (2 << 20)
    vmem_limit = int(min(max(needed, 32 << 20), 64 << 20))

    flops = bg * (num_layers * (2 * n_max * n_max * LANE
                                + 4 * n_max * LANE * LANE)
                  + 2 * n_max * LANE + 2 * LANE * LANE)
    bytes_accessed = (nbytes(a3) + nbytes(rdeg3) + nbytes(x3) + nbytes(pvec)
                      + weight_bytes + bg * c_pad * 4)
    cost = pl.CostEstimate(flops=int(flops), transcendentals=int(bg * c_pad),
                           bytes_accessed=int(bytes_accessed))

    out = pl.pallas_call(
        functools.partial(_fused_sage_kernel,
                          num_layers=num_layers, num_classes=num_classes),
        out_shape=jax.ShapeDtypeStruct((bg, 1, c_pad), jnp.float32),
        grid=(bg,),
        in_specs=in_specs,
        out_specs=out_specs,
        scratch_shapes=[pltpu.VMEM((n_max, LANE), jnp.bfloat16)],
        compiler_params=pltpu.CompilerParams(
            dimension_semantics=("parallel",),      # v7x: shard graphs over TCs
            vmem_limit_bytes=vmem_limit),
        cost_estimate=cost,
    )(a3, rdeg3, x3, pvec, w_stacked, b_stacked, wl_pad, bl_pad)
    return out.reshape(bg, c_pad)[:, :num_classes]


# ----------------------------------------------------------------------------
# Glue: graph structure -> per-graph dense blocks, deterministic param init
# ----------------------------------------------------------------------------
def glorot(key, shape):
    fan_in, fan_out = shape[0], shape[1]
    limit = jnp.sqrt(6.0 / (fan_in + fan_out))
    return jax.random.uniform(key, shape, jnp.float32, -limit, limit)


def init_params(key, in_dim, hidden, num_classes, num_layers):
    params = {"layers": []}
    dims_in = [in_dim] + [hidden] * (num_layers - 1)
    for d_in in dims_in:
        key, k1, k2 = jax.random.split(key, 3)
        params["layers"].append({
            "wr": glorot(k1, (d_in, hidden)),
            "wn": glorot(k2, (d_in, hidden)),
            "b": jnp.zeros((1, hidden), jnp.float32),
        })
    key, k3 = jax.random.split(key)
    params["lin_w"] = glorot(k3, (hidden, num_classes))   # = torch Linear.weight.T
    params["lin_b"] = jnp.zeros((1, num_classes), jnp.float32)
    return params


def _pad2(m, rows, cols):
    return jnp.pad(m, ((0, rows - m.shape[0]), (0, cols - m.shape[1])))


def prepare_operands(params, x, edge_index, batch, num_graphs):
    """Build per-graph block-diagonal operands + padded/stacked weights ONCE."""
    n = x.shape[0]
    counts = jnp.bincount(batch, length=num_graphs)                   # (B,)
    offsets = jnp.concatenate(
        [jnp.zeros((1,), counts.dtype), jnp.cumsum(counts)[:-1]])
    n_max_host = int(jax.device_get(jnp.max(counts)))
    n_max = max(ROW_PAD, -(-n_max_host // ROW_PAD) * ROW_PAD)         # mult of 16
    local = jnp.arange(n, dtype=jnp.int32) - offsets[batch].astype(jnp.int32)

    # Node features -> (B, n_max, LANE), zero-padded, bf16.
    x_pad = jnp.pad(x, ((0, 0), (0, LANE - x.shape[1])))
    x3 = jnp.zeros((num_graphs, n_max, LANE), jnp.float32)
    x3 = x3.at[batch, local].set(x_pad).astype(jnp.bfloat16)

    # Per-graph 0/1 adjacency blocks (exact in bf16) + f32 reciprocal degree.
    src, dst = edge_index[0], edge_index[1]
    a3 = jnp.zeros((num_graphs, n_max, n_max), jnp.float32)
    a3 = a3.at[batch[dst], local[dst], local[src]].add(1.0)
    deg = jnp.sum(a3, axis=-1, keepdims=True)                         # (B, n_max, 1)
    rdeg3 = (1.0 / jnp.maximum(deg, 1.0)).astype(jnp.float32)
    a3 = a3.astype(jnp.bfloat16)

    # Pool vector: 1/|graph g| at valid rows, 0 at padded rows (f32, exact).
    inv_cnt = 1.0 / jnp.maximum(counts, 1).astype(jnp.float32)
    pvec = jnp.zeros((num_graphs, n_max, 1), jnp.float32)
    pvec = pvec.at[batch, local, 0].set(inv_cnt[batch])

    # Per-layer stacked [Wr; Wn] -> (L, 2*LANE, LANE) bf16, biases (L, 1, LANE) f32.
    w_list, b_list = [], []
    for layer in params["layers"]:
        wr = _pad2(layer["wr"], LANE, LANE)
        wn = _pad2(layer["wn"], LANE, LANE)
        w_list.append(jnp.concatenate([wr, wn], axis=0))
        b_list.append(_pad2(layer["b"], 1, LANE))
    w_stacked = jnp.stack(w_list).astype(jnp.bfloat16)
    b_stacked = jnp.stack(b_list).astype(jnp.float32)

    wl_pad = _pad2(params["lin_w"], LANE, LANE).astype(jnp.bfloat16)
    bl_pad = _pad2(params["lin_b"], 1, LANE).astype(jnp.float32)
    return a3, rdeg3, x3, pvec, w_stacked, b_stacked, wl_pad, bl_pad


def sagenet_forward(params, x, edge_index, batch, num_graphs):
    num_layers = len(params["layers"])
    num_classes = params["lin_w"].shape[1]
    ops = prepare_operands(params, x, edge_index, batch, num_graphs)
    return sagenet_forward_fused(*ops, num_layers=num_layers,
                                 num_classes=num_classes)


# ----------------------------------------------------------------------------
# Main
# ----------------------------------------------------------------------------
if __name__ == "__main__":
    N_NODES = 16          # 2 graphs x 8 nodes
    NUM_FEATURES = 8      # dataset.num_features
    HIDDEN = 32
    NUM_CLASSES = 4       # dataset.num_classes
    NUM_LAYERS = 2
    NUM_GRAPHS = 2

    key = jax.random.PRNGKey(0)
    key, kx = jax.random.split(key)
    x = jax.random.normal(kx, (N_NODES, NUM_FEATURES), jnp.float32)

    # Two disjoint 8-node ring graphs (bidirectional edges).
    def ring_edges(offset, n):
        src = jnp.arange(n) + offset
        dst = (jnp.arange(n) + 1) % n + offset
        return jnp.stack([jnp.concatenate([src, dst]),
                          jnp.concatenate([dst, src])], axis=0)

    edge_index = jnp.concatenate(
        [ring_edges(0, 8), ring_edges(8, 8)], axis=1).astype(jnp.int32)  # [2, 32]
    batch = jnp.concatenate(
        [jnp.zeros(8, jnp.int32), jnp.ones(8, jnp.int32)])               # [16]

    params = init_params(key, NUM_FEATURES, HIDDEN, NUM_CLASSES, NUM_LAYERS)

    out = sagenet_forward(params, x, edge_index, batch, NUM_GRAPHS)
    out = jax.block_until_ready(out)

    assert out.shape == (NUM_GRAPHS, NUM_CLASSES)
    # log_softmax rows must exponentiate-sum to 1 (padded classes are masked out).
    row_sums = jnp.sum(jnp.exp(out), axis=-1)
    assert bool(jnp.all(jnp.abs(row_sums - 1.0) < 1e-3))
    assert bool(jnp.all(jnp.isfinite(out)))
    print("KERNEL_OK")
</pallas_src>

<mosaic_0001>
module attributes {stable_mosaic.version = 11 : i64} {
  func.func @_fused_sage_kernel(%arg0: i32, %arg1: memref<1x16x16xbf16, #tpu.memory_space<vmem>>, %arg2: memref<1x16x1xf32, #tpu.memory_space<vmem>>, %arg3: memref<1x16x128xbf16, #tpu.memory_space<vmem>>, %arg4: memref<1x16x1xf32, #tpu.memory_space<vmem>>, %arg5: memref<2x256x128xbf16, #tpu.memory_space<vmem>>, %arg6: memref<2x1x128xf32, #tpu.memory_space<vmem>>, %arg7: memref<128x128xbf16, #tpu.memory_space<vmem>>, %arg8: memref<1x128xf32, #tpu.memory_space<vmem>>, %arg9: memref<1x1x128xf32, #tpu.memory_space<vmem>>, %arg10: memref<16x128xbf16, #tpu.memory_space<vmem>>) attributes {dimension_semantics = [#tpu.dimension_semantics<parallel>], iteration_bounds = array<i64: 2>, scalar_prefetch = 0 : i64, scratch_operands = 1 : i64, tpu.core_type = #tpu.core_type<tc>, window_params = [{transform_indices = @transform_0, window_bounds = array<i64: 1, 16, 16>}, {transform_indices = @transform_1, window_bounds = array<i64: 1, 16, 1>}, {transform_indices = @transform_2, window_bounds = array<i64: 1, 16, 128>}, {transform_indices = @transform_3, window_bounds = array<i64: 1, 16, 1>}, {pipeline_mode = #tpu.pipeline_mode<synchronous>, transform_indices = @transform_4, window_bounds = array<i64: 2, 256, 128>}, {pipeline_mode = #tpu.pipeline_mode<synchronous>, transform_indices = @transform_5, window_bounds = array<i64: 2, 1, 128>}, {pipeline_mode = #tpu.pipeline_mode<synchronous>, transform_indices = @transform_6, window_bounds = array<i64: 128, 128>}, {pipeline_mode = #tpu.pipeline_mode<synchronous>, transform_indices = @transform_7, window_bounds = array<i64: 1, 128>}, {transform_indices = @transform_8, window_bounds = array<i64: 1, 1, 128>}]} {
    %c0 = arith.constant 0 : index
    %c0_0 = arith.constant 0 : index
    %c0_1 = arith.constant 0 : index
    %0 = vector.load %arg1[%c0, %c0_0, %c0_1] : memref<1x16x16xbf16, #tpu.memory_space<vmem>>, vector<1x16x16xbf16>
    %1 = vector.shape_cast %0 : vector<1x16x16xbf16> to vector<16x16xbf16>
    %c0_2 = arith.constant 0 : index
    %c0_3 = arith.constant 0 : index
    %c0_4 = arith.constant 0 : index
    %2 = vector.load %arg2[%c0_2, %c0_3, %c0_4] : memref<1x16x1xf32, #tpu.memory_space<vmem>>, vector<1x16x1xf32>
    %3 = vector.shape_cast %2 : vector<1x16x1xf32> to vector<16x1xf32>
    %c0_5 = arith.constant 0 : index
    %c0_6 = arith.constant 0 : index
    %c0_7 = arith.constant 0 : index
    %4 = vector.load %arg3[%c0_5, %c0_6, %c0_7] : memref<1x16x128xbf16, #tpu.memory_space<vmem>>, vector<1x16x128xbf16>
    %5 = vector.shape_cast %4 : vector<1x16x128xbf16> to vector<16x128xbf16>
    %c0_8 = arith.constant 0 : index
    %c0_9 = arith.constant 0 : index
    %6 = vector.load %arg10[%c0_8, %c0_9] : memref<16x128xbf16, #tpu.memory_space<vmem>>, vector<16x128xbf16>
    tpu.vector_store %arg10[%c0_8, %c0_9], %5 {strides = array<i32>} : memref<16x128xbf16, #tpu.memory_space<vmem>>, vector<16x128xbf16>,
    %c0_10 = arith.constant 0 : index
    %c0_11 = arith.constant 0 : index
    %7 = vector.load %arg10[%c0_10, %c0_11] : memref<16x128xbf16, #tpu.memory_space<vmem>>, vector<16x128xbf16>
    %cst = arith.constant dense<0.000000e+00> : vector<16x128xf32>
    %8 = tpu.matmul %1, %7, %cst {dimension_numbers = #tpu.dot_dimension_numbers<[1], [0], [0], [1], [0, 0, 1, 1], [], []>} : vector<16x16xbf16>, vector<16x128xbf16>, vector<16x128xf32> -> vector<16x128xf32>
    %9 = vector.broadcast %3 : vector<16x1xf32> to vector<16x128xf32>
    %10 = arith.mulf %8, %9 : vector<16x128xf32>
    %c0_12 = arith.constant 0 : index
    %c0_13 = arith.constant 0 : index
    %c0_14 = arith.constant 0 : index
    %11 = vector.load %arg5[%c0_12, %c0_13, %c0_14] : memref<2x256x128xbf16, #tpu.memory_space<vmem>>, vector<1x256x128xbf16>
    %12 = vector.shape_cast %11 : vector<1x256x128xbf16> to vector<256x128xbf16>
    %13 = vector.extract_strided_slice %12 {offsets = [0, 0], sizes = [128, 128], strides = [1, 1]} : vector<256x128xbf16> to vector<128x128xbf16>
    %cst_15 = arith.constant dense<0.000000e+00> : vector<16x128xf32>
    %14 = tpu.matmul %7, %13, %cst_15 {dimension_numbers = #tpu.dot_dimension_numbers<[1], [0], [0], [1], [0, 0, 1, 1], [], []>} : vector<16x128xbf16>, vector<128x128xbf16>, vector<16x128xf32> -> vector<16x128xf32>
    %15 = arith.truncf %10 : vector<16x128xf32> to vector<16x128xbf16>
    %16 = vector.extract_strided_slice %12 {offsets = [128, 0], sizes = [128, 128], strides = [1, 1]} : vector<256x128xbf16> to vector<128x128xbf16>
    %cst_16 = arith.constant dense<0.000000e+00> : vector<16x128xf32>
    %17 = tpu.matmul %15, %16, %cst_16 {dimension_numbers = #tpu.dot_dimension_numbers<[1], [0], [0], [1], [0, 0, 1, 1], [], []>} : vector<16x128xbf16>, vector<128x128xbf16>, vector<16x128xf32> -> vector<16x128xf32>
    %18 = arith.addf %14, %17 : vector<16x128xf32>
    %c0_17 = arith.constant 0 : index
    %c0_18 = arith.constant 0 : index
    %c0_19 = arith.constant 0 : index
    %19 = vector.load %arg6[%c0_17, %c0_18, %c0_19] : memref<2x1x128xf32, #tpu.memory_space<vmem>>, vector<1x1x128xf32>
    %20 = vector.shape_cast %19 : vector<1x1x128xf32> to vector<1x128xf32>
    %21 = vector.broadcast %20 : vector<1x128xf32> to vector<16x128xf32>
    %22 = arith.addf %18, %21 : vector<16x128xf32>
    %cst_20 = arith.constant 0.000000e+00 : f32
    %23 = vector.broadcast %cst_20 : f32 to vector<16x128xf32>
    %24 = arith.maximumf %22, %23 : vector<16x128xf32>
    %25 = arith.truncf %24 : vector<16x128xf32> to vector<16x128xbf16>
    %c0_21 = arith.constant 0 : index
    %c0_22 = arith.constant 0 : index
    %26 = vector.load %arg10[%c0_21, %c0_22] : memref<16x128xbf16, #tpu.memory_space<vmem>>, vector<16x128xbf16>
    tpu.vector_store %arg10[%c0_21, %c0_22], %25 {strides = array<i32>} : memref<16x128xbf16, #tpu.memory_space<vmem>>, vector<16x128xbf16>,
    %c0_23 = arith.constant 0 : index
    %c0_24 = arith.constant 0 : index
    %27 = vector.load %arg10[%c0_23, %c0_24] : memref<16x128xbf16, #tpu.memory_space<vmem>>, vector<16x128xbf16>
    %cst_25 = arith.constant dense<0.000000e+00> : vector<16x128xf32>
    %28 = tpu.matmul %1, %27, %cst_25 {dimension_numbers = #tpu.dot_dimension_numbers<[1], [0], [0], [1], [0, 0, 1, 1], [], []>} : vector<16x16xbf16>, vector<16x128xbf16>, vector<16x128xf32> -> vector<16x128xf32>
    %29 = vector.broadcast %3 : vector<16x1xf32> to vector<16x128xf32>
    %30 = arith.mulf %28, %29 : vector<16x128xf32>
    %c1 = arith.constant 1 : index
    %c0_26 = arith.constant 0 : index
    %c0_27 = arith.constant 0 : index
    %31 = vector.load %arg5[%c1, %c0_26, %c0_27] : memref<2x256x128xbf16, #tpu.memory_space<vmem>>, vector<1x256x128xbf16>
    %32 = vector.shape_cast %31 : vector<1x256x128xbf16> to vector<256x128xbf16>
    %33 = vector.extract_strided_slice %32 {offsets = [0, 0], sizes = [128, 128], strides = [1, 1]} : vector<256x128xbf16> to vector<128x128xbf16>
    %cst_28 = arith.constant dense<0.000000e+00> : vector<16x128xf32>
    %34 = tpu.matmul %27, %33, %cst_28 {dimension_numbers = #tpu.dot_dimension_numbers<[1], [0], [0], [1], [0, 0, 1, 1], [], []>} : vector<16x128xbf16>, vector<128x128xbf16>, vector<16x128xf32> -> vector<16x128xf32>
    %35 = arith.truncf %30 : vector<16x128xf32> to vector<16x128xbf16>
    %36 = vector.extract_strided_slice %32 {offsets = [128, 0], sizes = [128, 128], strides = [1, 1]} : vector<256x128xbf16> to vector<128x128xbf16>
    %cst_29 = arith.constant dense<0.000000e+00> : vector<16x128xf32>
    %37 = tpu.matmul %35, %36, %cst_29 {dimension_numbers = #tpu.dot_dimension_numbers<[1], [0], [0], [1], [0, 0, 1, 1], [], []>} : vector<16x128xbf16>, vector<128x128xbf16>, vector<16x128xf32> -> vector<16x128xf32>
    %38 = arith.addf %34, %37 : vector<16x128xf32>
    %c1_30 = arith.constant 1 : index
    %c0_31 = arith.constant 0 : index
    %c0_32 = arith.constant 0 : index
    %39 = vector.load %arg6[%c1_30, %c0_31, %c0_32] : memref<2x1x128xf32, #tpu.memory_space<vmem>>, vector<1x1x128xf32>
    %40 = vector.shape_cast %39 : vector<1x1x128xf32> to vector<1x128xf32>
    %41 = vector.broadcast %40 : vector<1x128xf32> to vector<16x128xf32>
    %42 = arith.addf %38, %41 : vector<16x128xf32>
    %cst_33 = arith.constant 0.000000e+00 : f32
    %43 = vector.broadcast %cst_33 : f32 to vector<16x128xf32>
    %44 = arith.maximumf %42, %43 : vector<16x128xf32>
    %45 = arith.truncf %44 : vector<16x128xf32> to vector<16x128xbf16>
    %c0_34 = arith.constant 0 : index
    %c0_35 = arith.constant 0 : index
    %46 = vector.load %arg10[%c0_34, %c0_35] : memref<16x128xbf16, #tpu.memory_space<vmem>>, vector<16x128xbf16>
    tpu.vector_store %arg10[%c0_34, %c0_35], %45 {strides = array<i32>} : memref<16x128xbf16, #tpu.memory_space<vmem>>, vector<16x128xbf16>,
    %c0_36 = arith.constant 0 : index
    %c0_37 = arith.constant 0 : index
    %47 = vector.load %arg10[%c0_36, %c0_37] : memref<16x128xbf16, #tpu.memory_space<vmem>>, vector<16x128xbf16>
    %48 = arith.extf %47 : vector<16x128xbf16> to vector<16x128xf32>
    %c0_38 = arith.constant 0 : index
    %c0_39 = arith.constant 0 : index
    %c0_40 = arith.constant 0 : index
    %49 = vector.load %arg4[%c0_38, %c0_39, %c0_40] : memref<1x16x1xf32, #tpu.memory_space<vmem>>, vector<1x16x1xf32>
    %50 = vector.shape_cast %49 : vector<1x16x1xf32> to vector<16x1xf32>
    %51 = vector.broadcast %50 : vector<16x1xf32> to vector<16x128xf32>
    %52 = arith.mulf %48, %51 : vector<16x128xf32>
    %cst_41 = arith.constant dense<0.000000e+00> : vector<128xf32>
    %53 = vector.multi_reduction <add>, %52, %cst_41 [0] : vector<16x128xf32> to vector<128xf32>
    %54 = vector.shape_cast %53 : vector<128xf32> to vector<1x128xf32>
    %55 = arith.truncf %54 : vector<1x128xf32> to vector<1x128xbf16>
    %c0_42 = arith.constant 0 : index
    %c0_43 = arith.constant 0 : index
    %56 = vector.load %arg7[%c0_42, %c0_43] : memref<128x128xbf16, #tpu.memory_space<vmem>>, vector<128x128xbf16>
    %cst_44 = arith.constant dense<0.000000e+00> : vector<1x128xf32>
    %57 = tpu.matmul %55, %56, %cst_44 {dimension_numbers = #tpu.dot_dimension_numbers<[1], [0], [0], [1], [0, 0, 1, 1], [], []>} : vector<1x128xbf16>, vector<128x128xbf16>, vector<1x128xf32> -> vector<1x128xf32>
    %c0_45 = arith.constant 0 : index
    %c0_46 = arith.constant 0 : index
    %58 = vector.load %arg8[%c0_45, %c0_46] : memref<1x128xf32, #tpu.memory_space<vmem>>, vector<1x128xf32>
    %59 = arith.addf %57, %58 : vector<1x128xf32>
    %60 = tpu.iota {dimensions = array<i32: 1>} : vector<1x128xi32>
    %c4_i32 = arith.constant 4 : i32
    %61 = vector.broadcast %c4_i32 : i32 to vector<1x128xi32>
    %62 = arith.cmpi slt, %60, %61 : vector<1x128xi32>
    %cst_47 = arith.constant -1.000000e+30 : f32
    %63 = vector.broadcast %cst_47 : f32 to vector<1x128xf32>
    %64 = arith.select %62, %59, %63 : vector<1x128xi1>, vector<1x128xf32>
    %cst_48 = arith.constant dense<0xFF800000> : vector<1xf32>
    %65 = vector.multi_reduction <maximumf>, %64, %cst_48 [1] : vector<1x128xf32> to vector<1xf32>
    %66 = vector.shape_cast %65 : vector<1xf32> to vector<1x1xf32>
    %67 = vector.broadcast %66 : vector<1x1xf32> to vector<1x128xf32>
    %68 = arith.subf %64, %67 : vector<1x128xf32>
    %69 = math.exp %68 : vector<1x128xf32>
    %cst_49 = arith.constant dense<0.000000e+00> : vector<1xf32>
    %70 = vector.multi_reduction <add>, %69, %cst_49 [1] : vector<1x128xf32> to vector<1xf32>
    %71 = vector.shape_cast %70 : vector<1xf32> to vector<1x1xf32>
    %72 = math.log %71 : vector<1x1xf32>
    %73 = arith.addf %66, %72 : vector<1x1xf32>
    %74 = vector.broadcast %73 : vector<1x1xf32> to vector<1x128xf32>
    %75 = arith.subf %64, %74 : vector<1x128xf32>
    %c0_50 = arith.constant 0 : index
    %c0_51 = arith.constant 0 : index
    %c0_52 = arith.constant 0 : index
    %76 = vector.load %arg9[%c0_50, %c0_51, %c0_52] : memref<1x1x128xf32, #tpu.memory_space<vmem>>, vector<1x1x128xf32>
    %77 = vector.shape_cast %76 : vector<1x1x128xf32> to vector<1x128xf32>
    %78 = vector.shape_cast %75 : vector<1x128xf32> to vector<1x1x128xf32>
    tpu.vector_store %arg9[%c0_50, %c0_51, %c0_52], %78 {strides = array<i32>} : memref<1x1x128xf32, #tpu.memory_space<vmem>>, vector<1x1x128xf32>,
    return
  }
  func.func @transform_0(%arg0: i32) -> (i32, i32, i32) {
    %c0_i32 = arith.constant 0 : i32
    %c0_i32_0 = arith.constant 0 : i32
    %c0_i32_1 = arith.constant 0 : i32
    return %arg0, %c0_i32, %c0_i32_0 : i32, i32, i32
  }
  func.func @transform_1(%arg0: i32) -> (i32, i32, i32) {
    %c0_i32 = arith.constant 0 : i32
    %c0_i32_0 = arith.constant 0 : i32
    %c0_i32_1 = arith.constant 0 : i32
    return %arg0, %c0_i32, %c0_i32_0 : i32, i32, i32
  }
  func.func @transform_2(%arg0: i32) -> (i32, i32, i32) {
    %c0_i32 = arith.constant 0 : i32
    %c0_i32_0 = arith.constant 0 : i32
    %c0_i32_1 = arith.constant 0 : i32
    return %arg0, %c0_i32, %c0_i32_0 : i32, i32, i32
  }
  func.func @transform_3(%arg0: i32) -> (i32, i32, i32) {
    %c0_i32 = arith.constant 0 : i32
    %c0_i32_0 = arith.constant 0 : i32
    %c0_i32_1 = arith.constant 0 : i32
    return %arg0, %c0_i32, %c0_i32_0 : i32, i32, i32
  }
  func.func @transform_4(%arg0: i32) -> (i32, i32, i32) {
    %c0_i32 = arith.constant 0 : i32
    %c0_i32_0 = arith.constant 0 : i32
    %c0_i32_1 = arith.constant 0 : i32
    %c0_i32_2 = arith.constant 0 : i32
    return %c0_i32, %c0_i32_0, %c0_i32_1 : i32, i32, i32
  }
  func.func @transform_5(%arg0: i32) -> (i32, i32, i32) {
    %c0_i32 = arith.constant 0 : i32
    %c0_i32_0 = arith.constant 0 : i32
    %c0_i32_1 = arith.constant 0 : i32
    %c0_i32_2 = arith.constant 0 : i32
    return %c0_i32, %c0_i32_0, %c0_i32_1 : i32, i32, i32
  }
  func.func @transform_6(%arg0: i32) -> (i32, i32) {
    %c0_i32 = arith.constant 0 : i32
    %c0_i32_0 = arith.constant 0 : i32
    %c0_i32_1 = arith.constant 0 : i32
    return %c0_i32, %c0_i32_0 : i32, i32
  }
  func.func @transform_7(%arg0: i32) -> (i32, i32) {
    %c0_i32 = arith.constant 0 : i32
    %c0_i32_0 = arith.constant 0 : i32
    %c0_i32_1 = arith.constant 0 : i32
    return %c0_i32, %c0_i32_0 : i32, i32
  }
  func.func @transform_8(%arg0: i32) -> (i32, i32, i32) {
    %c0_i32 = arith.constant 0 : i32
    %c0_i32_0 = arith.constant 0 : i32
    %c0_i32_1 = arith.constant 0 : i32
    return %arg0, %c0_i32, %c0_i32_0 : i32, i32, i32
  }
}

</mosaic_0001>

<bundles_post_ra>
// kernel: tpu_custom_call.1
= control target key start
LH: loop header
LB: loop body
LE: loop exit
PB: predicated region body
PF: predicated region fallthrough
CT: control target
= control target key end

     0   :  { %s2219_s0 = inlined_call_operand.hbm [shape: bf16[2,16,16], index: 0, kind: input, shape index: {}]   ;;  %s2220_s1 = inlined_call_operand.vmem [shape: f32[2,16,1], index: 1, kind: input, shape index: {}]   ;;  %s2221_s2 = inlined_call_operand.hbm [shape: bf16[2,16,128], index: 2, kind: input, shape index: {}]   ;;  %s2222_s3 = inlined_call_operand.vmem [shape: f32[2,16,1], index: 3, kind: input, shape index: {}]   ;;  %s2223_s4 = inlined_call_operand.hbm [shape: bf16[2,256,128], index: 4, kind: input, shape index: {}]   ;;  %s2224_s5 = inlined_call_operand.vmem [shape: f32[2,1,128], index: 5, kind: input, shape index: {}]   ;;  %s2225_s6 = inlined_call_operand.vmem [shape: bf16[128,128], index: 6, kind: input, shape index: {}]   ;;  %s2226_s7 = inlined_call_operand.vmem [shape: f32[1,128], index: 7, kind: input, shape index: {}]   ;;  %s2227_s8 = inlined_call_operand.hbm [shape: f32[2,1,128], index: 8, kind: output, shape index: {}]  }
   0x1   :  { %2240 = sst [smem:[#allocation19_spill]] %s2219_s0 }
   0x2   :  { %2241 = sst [smem:[#allocation20_spill]] %s2223_s4 }
   0x3   :  { %13 = vsyncpa [#allocation4], 0 }
   0x4   :  { %15 = vsyncpa [#allocation4 + $0x1], 0 }
   0x5   :  { %16 = vsyncpa [#allocation7], 0 }
   0x6   :  { %18 = vsyncpa [#allocation7 + $0x1], 0 }
   0x7   :  { %19 = vsyncpa [#allocation5], 0 }
   0x8   :  { %21 = vsyncpa [#allocation5 + $0x1], 0  ;;  %s1880_s27 = smov 0   ;;  %s1882_s28 = smov 0  }
   0x9   :  { %s1884_s29 = smov 0   ;;  %s1886_s30 = smov 0  }
   0xa LB: > { %2242 = sst [smem:[#allocation14_spill]] %s1812_s27  ;;  %s1901_s9 = sadd.s32 4294967295, %s1824_s30   ;;  %s1824_s30 = sphi %s1886_s30, %s2266_s30   ;;  %s1820_s29 = sphi %s1884_s29, %s2268_s29   ;;  %s1816_s28 = sphi %s1882_s28, %s2270_s28   ;;  %s1812_s27 = sphi %s1880_s27, %s2269_s27  }
   0xb   : > { %2243 = sst [smem:[#allocation15_spill]] %s1820_s29  ;;  %s1298_s10 = sadd.s32 4294967294, %s1824_s30  }
   0xc   : > { %p47_p0 = scmp.ne.s32.totalorder %s1816_s28, %s1812_s27  ;;  %p2236_p1 = scmp.eq.s32.totalorder %s1901_s9, 0 }
   0xd   : > { %p239_p3 = scmp.eq.s32.totalorder %s1298_s10, 1  ;;  %p1299_p5 = scmp.ge.s32.totalorder %s1824_s30, 1 }
   0xe   : > { %p1910_p4 = por %p2236_p1, %p47_p0  ;;  %p246_p7 = scmp.lt.s32.totalorder %s1824_s30, 3 }
   0xf   : > { %p1915_p6 = por %p239_p3, %p47_p0  ;;  %s1826_s14 = smov [#allocation8]  }
  0x10   : > { %s2244_s11 = scalar_select %p1910_p4, 1, 0 }
  0x11   : > { %s2245_s12 = scalar_select %p1915_p6, 1, 0 }
  0x12   : > { %p1920_p8 = pnand %p1299_p5, %p246_p7  ;;  %s258_s15 = sshll.u32 %s1826_s14, 4  ;;  %s259_s15 = int_to_ptr.vmem [resolvable:$true] %s258_s15 }
  0x13   : > { %2246 = sst [smem:[#allocation16_spill]] %s2245_s12  ;;  %s1934_s17 = sadd.s32 1, %s1824_s30  }
  0x14   : > { %p1564_p9 = pneg %p1920_p8  ;;  %2249 = sst [smem:[#allocation17_spill]] %s1934_s17 }
  0x15   : > { %s34_s18 = sadd.s32 1, %s1820_s29  ;;  %s31_s19 = ssub.s32 %s1824_s30, %s1934_s17 }
  0x16   : > { %p1929_p11 = pnand %p1564_p9, %p2236_p1  ;;  %s1681_s20 = scalar_lea.vmem %s259_s15, 4096 }
  0x17   : > { %p1682_p13 = scmp.ne.s32.totalorder %s259_s15, %s1681_s20  ;;  %p1689_p5 = scmp.lt.s32.totalorder %s259_s15, %s259_s15 }
  0x18   : > { %p1672_p12 = pneg %p1929_p11  ;;  %p1690_p7 = scmp.lt.s32.totalorder %s1681_s20, %s1681_s20 }
  0x1a   : > { %p1684_p0 = pnand %p1682_p13, %p1672_p12  ;;  %p1691_p10 = por %p1690_p7, %p1689_p5 }
  0x1c   : > { %p1685_p3 = pneg %p1684_p0 }
  0x1e   : > { %p1692_p2 = pnand %p1691_p10, %p1685_p3 }
  0x20   : > { %1695 = shalt.err (!%p1692_p2)
}
  0x21   : > { %s2230_s21 = smov 64   ;;  %s2232_s22 = smov 4  }
  0x22   : > { %s2250_s4 = sld [smem:[#allocation20_spill]]  ;;  %p32_p2 = scmp.eq.s32.totalorder %s31_s19, 0 }
  0x23   : > { %p41_p9 = scmp.ne.s32.totalorder %s1820_s29, %s1816_s28  ;;  %p42_p10 = scmp.eq.s32.totalorder %s1824_s30, 0 }
  0x24   : > { %p1580_p12 = scmp.lt.s32.totalorder %s1824_s30, 2  ;;  %p2252_p0 = scmp.eq.s32.totalorder %s1901_s9, 1 }
  0x25   : > { %s1954_s25 = scalar_select %p32_p2, %s1820_s29, %s34_s18  }
  0x26   : > { %p43_p13 = por %p42_p10, %p41_p9  ;;  %p1958_p3 = por %p2252_p0, %p41_p9 }
  0x27   : > { %2251 = sst [smem:[#allocation18_spill]] %s1954_s25  ;;  %s281_s10 = sand.u32 1, %s1820_s29  }
  0x28   : > { %1567 = dma.hbm_to_vmem [thread:$0]  (!%p1929_p11), %s2250_s4, 4096, %s259_s15, [#allocation7], %s2230_s21, %s2230_s21, %s2232_s22  }
  0x29   : > { %s2253_s26 = scalar_select %p1958_p3, 1, 0 }
  0x2a   : > { %s1371_s14 = sshll.u32 %s1824_s30, 7  ;;  %s1964_s16 = sshll.u32 %s281_s10, 3 }
  0x2b   : > { %s2254_s0 = sld [smem:[#allocation19_spill]]  ;;  %s285_s18 = scalar_lea.vmem [#allocation3], %s1964_s16 }
  0x2c   : > { %s292_s19 = sshll.u32 %s285_s18, 4  ;;  %p1972_p11 = pnand %p1580_p12, %p43_p13  ;;  %s1976_s19 = int_to_ptr.vmem [resolvable:$true] %s292_s19 }
  0x2d   : > { %s1981_s17 = scalar_lea.hbm %s2221_s2, %s1371_s14  ;;  %s1983_s20 = scalar_lea.sflag [#allocation4], %s281_s10 }
  0x2e   : > { %p1698_p7 = pneg %p1972_p11 }
  0x31   : > { %s1969_s15 = scalar_lea.hbm %s2254_s0, %s1371_s14  ;;  %s1701_s25 = scalar_lea.hbm %s2254_s0, 256 }
  0x32   : > { %s1696_s22 = scalar_lea.hbm %s1969_s15, 128  ;;  %p1702_p10 = scmp.lt.s32.totalorder %s1969_s15, %s2254_s0 }
  0x33   : > { %p1697_p5 = scmp.ne.s32.totalorder %s1969_s15, %s1696_s22  ;;  %p1703_p12 = scmp.lt.s32.totalorder %s1701_s25, %s1696_s22 }
  0x35   : > { %p1699_p2 = pnand %p1698_p7, %p1697_p5  ;;  %p1704_p13 = por %p1703_p12, %p1702_p10 }
  0x37   : > { %p1700_p9 = pneg %p1699_p2 }
  0x39   : > { %p1705_p0 = pnand %p1704_p13, %p1700_p9 }
  0x3b   : > { %1708 = shalt.err (!%p1705_p0)
}
  0x3c   : > { %s1709_s21 = scalar_lea.vmem %s1976_s19, 128  ;;  %s1829_s4 = smov [#allocation3]  }
  0x3d   : > { %p1710_p1 = scmp.ne.s32.totalorder %s1976_s19, %s1709_s21  ;;  %s1714_s10 = sshll.u32 %s1829_s4, 4  ;;  %s1715_s10 = int_to_ptr.vmem [resolvable:$false] %s1714_s10 }
  0x3e   : > { %s1716_s14 = scalar_lea.vmem %s1715_s10, 256  ;;  %p1717_p6 = scmp.lt.s32.totalorder %s1976_s19, %s1715_s10 }
  0x3f   : > { %p1712_p5 = pnand %p1710_p1, %p1698_p7  ;;  %p1718_p3 = scmp.lt.s32.totalorder %s1716_s14, %s1709_s21 }
  0x41   : > { %p1713_p2 = pneg %p1712_p5  ;;  %p1719_p4 = por %p1718_p3, %p1717_p6 }
  0x43   : > { %p1720_p10 = pnand %p1719_p4, %p1713_p2 }
  0x45   : > { %1723 = shalt.err (!%p1720_p10)
}
  0x46   : > { %s2256_s29 = smov 4   ;;  %s2257_s12 = smov 64  }
  0x47   : > { %1571 = dma.hbm_to_vmem [thread:$0]  (!%p1972_p11), %s1969_s15, 128, %s1976_s19, %s1983_s20, %s2257_s12, %s2257_s12, %s2256_s29  }
  0x48   : > { %s314_s22 = scalar_lea.vmem [#allocation6], %s1964_s16  ;;  %s310_s24 = sand.u32 1, %s1824_s30  }
  0x49   : > { %s321_s25 = sshll.u32 %s314_s22, 4  ;;  %s311_s18 = scalar_lea.sflag [#allocation7], %s310_s24  ;;  %s2015_s25 = int_to_ptr.vmem [resolvable:$true] %s321_s25 }
  0x4a   : > { %s1724_s21 = scalar_lea.hbm %s1981_s17, 128  ;;  %s1729_s14 = scalar_lea.hbm %s2221_s2, 256 }
  0x4b   : > { %p1725_p1 = scmp.ne.s32.totalorder %s1981_s17, %s1724_s21  ;;  %p1730_p3 = scmp.lt.s32.totalorder %s1981_s17, %s2221_s2 }
  0x4c   : > { %p1731_p9 = scmp.lt.s32.totalorder %s1729_s14, %s1724_s21 }
  0x4d   : > { %p1727_p4 = pnand %p1725_p1, %p1698_p7 }
  0x4e   : > { %p1732_p12 = por %p1731_p9, %p1730_p3 }
  0x4f   : > { %p1728_p6 = pneg %p1727_p4 }
  0x51   : > { %p1733_p13 = pnand %p1732_p12, %p1728_p6 }
  0x53   : > { %1736 = shalt.err (!%p1733_p13)
}
  0x54   : > { %s1737_s16 = scalar_lea.vmem %s2015_s25, 128  ;;  %s1830_s15 = smov [#allocation6]  }
  0x55   : > { %p1738_p0 = scmp.ne.s32.totalorder %s2015_s25, %s1737_s16  ;;  %s1742_s19 = sshll.u32 %s1830_s15, 4  ;;  %s1743_s19 = int_to_ptr.vmem [resolvable:$false] %s1742_s19 }
  0x56   : > { %s1744_s20 = scalar_lea.vmem %s1743_s19, 256  ;;  %p1745_p10 = scmp.lt.s32.totalorder %s2015_s25, %s1743_s19 }
  0x57   : > { %p1740_p5 = pnand %p1738_p0, %p1698_p7  ;;  %p1746_p1 = scmp.lt.s32.totalorder %s1744_s20, %s1737_s16 }
  0x59   : > { %p1741_p2 = pneg %p1740_p5  ;;  %p1747_p4 = por %p1746_p1, %p1745_p10 }
  0x5b   : > { %p1748_p3 = pnand %p1747_p4, %p1741_p2 }
  0x5d   : > { %1751 = shalt.err (!%p1748_p3)
}
  0x5e   : > { %1574 = dma.hbm_to_vmem [thread:$0]  (!%p1972_p11), %s1981_s17, 128, %s2015_s25, %s311_s18, %s2257_s12, %s2257_s12, %s2256_s29  }
  0x5f   : > { %341 = sbr.rel (%p1920_p8) target bundleno = 1487 (0x5cf), region = 52  ;;  %s2045_s0 = sand.u32 (!%p1920_p8), 1, %s1816_s28  }
  0x60   : > { %s1309_s27 = sshll.u32 (!%p1920_p8), %s2045_s0, 3  ;;  %s344_s22 = scalar_lea.sflag (!%p1920_p8), [#allocation4], %s2045_s0 }
  0x61   : > { %s2049_s24 = scalar_lea.vmem (!%p1920_p8), [#allocation3], %s1309_s27  ;;  %p2258_p7 = scmp.ne.s32.totalorder (!%p1920_p8), %s2244_s11, 0 }
  0x64   : > { %1795 = dma.done.wait (%p2258_p7), %s344_s22, 128  }
  0x65   : > { %1797 = vsyncadd (%p2258_p7), %s344_s22, 4294967168  ;;  %s352_s23 = sand.u32 1, %s1901_s9   ;;  %s356_s17 = scalar_lea.vmem [#allocation6], %s1309_s27 }
  0x66   : > { %s353_s13 = scalar_lea.sflag [#allocation7], %s352_s23 }
  0x67   : > { %1799 = dma.done.wait (%p2258_p7), %s353_s13, 128  }
  0x68   : > { %1801 = vsyncadd (%p2258_p7), %s353_s13, 4294967168  ;;  %p2259_p8 = scmp.eq.s32.totalorder %s1901_s9, 0 }
  0x6a   : > { %1803 = dma.done.wait (%p2259_p8), [#allocation7], 4096   ;;  %p2260_p11 = pmov %p2259_p8 }
  0x6b   : > { %v1831_v0 = vmov 0.0   ;;  %vm1832_vm0 = vmmov 0   ;;  %p407_p6 = scmp.lt.s32.totalorder %s1901_s9, 1  ;;  %v1833_v1 = vmov 0   ;;  %v422_v2 = vld [vmem:[%s356_s17] sm:$0xff]   ;;  %v1628_v7 = vld [vmem:[#allocation8 + $0x28] sm:$0xff]  }
  0x6c   : > { %1805 = vsyncadd (%p2260_p11), [#allocation7], 4294963200  ;;  %1442 = vmatprep.subr.bf16.mxu1 %v1831_v0  ;;  %1444 = vmatprep.mubr.msk.bf16.mxu1 %vm1832_vm0, %v1831_v0  ;;  %424 = vst [vmem:[#allocation2] sm:$0xff] %v422_v2   ;;  %v1625_v4 = vld [vmem:[#allocation8 + $0x38] sm:$0xff]   ;;  %v1626_v6 = vld [vmem:[#allocation8 + $0x30] sm:$0xff]   ;;  %vm439_vm1 = vcmask 130048  }
  0x6d   : > { %1621 = vset.pattern.permute.xlu0 %v1833_v1  ;;  %1468 = vmatprep.subr.bf16.mxu0 %v1831_v0  ;;  %s2070_s11 = scalar_select %p407_p6, %s1901_s9, 1  ;;  %v2082_v9 = vld [vmem:[%s2049_s24] sm:$0xff]   ;;  %v1627_v10 = vld [vmem:[#allocation8 + $0x78] sm:$0xff]   ;;  %v1629_v12 = vld [vmem:[#allocation8 + $0x70] sm:$0xff]   ;;  %vm1148_vm3 = vcmask 1040384  }
  0x6e   : > { %1484 = vmatprep.mubr.msk.bf16.mxu0 %vm1832_vm0, %v1831_v0  ;;  %1622 = vset.pattern.permute.xlu1 %v1833_v1  ;;  %v1630_v11 = vld [vmem:[#allocation8 + $0x20] sm:$0xff]   ;;  %v1631_v13 = vld [vmem:[#allocation8 + $0x68] sm:$0xff]   ;;  %v1632_v14 = vld [vmem:[#allocation8 + $0x18] sm:$0xff]   ;;  %s1368_s19 = sshll.u32 %s1901_s9, 4  ;;  %s406_s20 = scalar_lea.vmem [#allocation9], %s2045_s0 }
  0x6f   : > { %s1373_s29 = sshll.u32 %s2070_s11, 4  ;;  %1469 = vmatpush3.bf16.msra.mxu0 %v1625_v4  ;;  %v1634_v15 = vld [vmem:[#allocation8 + $0x10] sm:$0xff]   ;;  %v1633_v16 = vld [vmem:[#allocation8 + $0x60] sm:$0xff]   ;;  %v1636_v17 = vld [vmem:[#allocation8 + $0x8] sm:$0xff]   ;;  %s1176_s27 = sshll.u32 %s406_s20, 4  ;;  %s1177_s27 = int_to_ptr.vmem [resolvable:$true] %s1176_s27 }
  0x70   : > { %s411_s18 = scalar_lea.vmem %s2220_s1, %s1373_s29  ;;  %1470 = vmatprep.subr.bf16.mxu0 %v1831_v0  ;;  %v1635_v18 = vld [vmem:[#allocation8 + $0x58] sm:$0xff]   ;;  %v1638_v19 = vld [vmem:[#allocation8] sm:$0xff]   ;;  %v1637_v20 = vld [vmem:[#allocation8 + $0x50] sm:$0xff]   ;;  %s416_s16 = scalar_lea.vmem %s2222_s3, %s1373_s29 }
  0x71   : > { %v420_v3 = vld [vmem:[%s411_s18] sm:$0xff]  ;;  %v421_v5 = vld [vmem:[%s411_s18 + $0x8] sm:$0xff]  ;;  %v1639_v21 = vld [vmem:[#allocation8 + $0x48] sm:$0xff]   ;;  %s1174_s23 = scalar_lea.hbm %s2227_s8, %s1368_s19  ;;  %s1164_s13 = scalar_lea.sflag [#allocation5], %s2045_s0 }
  0x72   : > { %486 = vperm.xlu0 %1621, %v420_v3   ;;  %v1640_v22 = vld [vmem:[#allocation8 + $0x40] sm:$0xff]   ;;  %v1650_v36 = vld [vmem:[#allocation8 + $0xf8] sm:$0xff]   ;;  %v1651_v37 = vld [vmem:[#allocation8 + $0xf0] sm:$0xff]   ;;  %s1752_s17 = scalar_lea.vmem %s1177_s27, 16  ;;  %p2261_p12 = scmp.ne.s32.totalorder %s2253_s26, 0 }
  0x73   : > { %v1623_v8 = vld [vmem:[#allocation2] sm:$0xff]   ;;  %1471 = vmatpush3.bf16.msra.mxu0 %v1626_v6  ;;  %v1652_v38 = vld [vmem:[#allocation8 + $0xe8] sm:$0xff]   ;;  %v1653_v39 = vld [vmem:[#allocation8 + $0xe0] sm:$0xff]   ;;  %p1753_p9 = scmp.ne.s32.totalorder %s1177_s27, %s1752_s17  ;;  %s1834_s11 = smov [#allocation9]  }
  0x74   : > { %1472 = vmatprep.subr.bf16.mxu0 %v1831_v0  ;;  %1443 = vmatpush3.bf16.msra.mxu1 %v1623_v8  ;;  %v1654_v40 = vld [vmem:[#allocation8 + $0xd8] sm:$0xff]   ;;  %v1655_v41 = vld [vmem:[#allocation8 + $0xd0] sm:$0xff]   ;;  %v1644_v57 = vld [vmem:[#allocation8 + $0xa8] sm:$0xff]   ;;  %s1756_s29 = sshll.u32 %s1834_s11, 4  ;;  %s1757_s29 = int_to_ptr.vmem [resolvable:$false] %s1756_s29 }
  0x75   : > { %1448 = vmatprep.subr.bf16.mxu1 %v1831_v0  ;;  %v1335_v44 = vld [vmem:[%s2224_s5] ss:$0 sm:$0xff]  ;;  %v1643_v56 = vld [vmem:[#allocation8 + $0xb0] sm:$0xff]   ;;  %v1645_v58 = vld [vmem:[#allocation8 + $0xa0] sm:$0xff]   ;;  %p1754_p13 = pnand %p1753_p9, %p2261_p12  ;;  %s1758_s9 = scalar_lea.vmem %s1757_s29, 32 }
  0x76   : > { %491 = vperm.xlu0 %1621, %v421_v5   ;;  %v1642_v55 = vld [vmem:[#allocation8 + $0xb8] sm:$0xff]   ;;  %v1647_v60 = vld [vmem:[#allocation8 + $0x90] sm:$0xff]   ;;  %v1648_v61 = vld [vmem:[#allocation8 + $0x88] sm:$0xff]   ;;  %p1759_p5 = scmp.lt.s32.totalorder %s1177_s27, %s1757_s29  ;;  %p1760_p2 = scmp.lt.s32.totalorder %s1758_s9, %s1752_s17 }
  0x77   : > { %1473 = vmatpush3.bf16.msra.mxu0 %v1628_v7  ;;  %1445 = vmatmul.mubr.msk.bf16.vlgmr.msra.gmra.mxu1 %vm439_vm1, %v2082_v9  ;;  %v1646_v59 = vld [vmem:[#allocation8 + $0x98] sm:$0xff]   ;;  %v1649_v62 = vld [vmem:[#allocation8 + $0x80] sm:$0xff]   ;;  %v1656_v63 = vld [vmem:[#allocation8 + $0xc8] sm:$0xff]   ;;  %p1755_p0 = pneg %p1754_p13 }
  0x78   : > { %1474 = vmatprep.subr.bf16.mxu0 %v1831_v0  ;;  %1449 = vmatpush3.bf16.msra.mxu1 %v1627_v10  ;;  %v1657_v1 = vld [vmem:[#allocation8 + $0xc0] sm:$0xff]   ;;  %v1017_v2 = vld [vmem:[%s416_s16] sm:$0xff]  ;;  %p1761_p10 = por %p1760_p2, %p1759_p5 }
  0x79   : > { %1464 = vmatprep.mubr.msk.bf16.mxu1 %vm1832_vm0, %v1831_v0  ;;  %1450 = vmatprep.subr.bf16.mxu1 %v1831_v0  ;;  %v1018_v3 = vld [vmem:[%s416_s16 + $0x8] sm:$0xff] }
  0x7a   : > { %1021 = vperm.xlu1 %1622, %v1017_v2   ;;  %p1762_p1 = pnand %p1761_p10, %p1755_p0 }
  0x7b   : > { %1475 = vmatpush3.bf16.msra.mxu0 %v1630_v11 }
  0x7c   : > { %1476 = vmatprep.subr.bf16.mxu0 %v1831_v0  ;;  %1451 = vmatpush3.bf16.msra.mxu1 %v1629_v12 }
  0x7d   : > { %1452 = vmatprep.subr.bf16.mxu1 %v1831_v0 }
  0x7e   : > { %1026 = vperm.xlu1 %1622, %v1018_v3  }
  0x7f   : > { %1477 = vmatpush3.bf16.msra.mxu0 %v1632_v14 }
  0x80   : > { %1478 = vmatprep.subr.bf16.mxu0 %v1831_v0  ;;  %1453 = vmatpush3.bf16.msra.mxu1 %v1631_v13 }
  0x81   : > { %1454 = vmatprep.subr.bf16.mxu1 %v1831_v0 }
  0x83   : > { %1479 = vmatpush3.bf16.msra.mxu0 %v1634_v15  ;;  %v1658_v15 = vld [vmem:[%s2225_s6 + $0x38] sm:$0xff]  }
  0x84   : > { %1480 = vmatprep.subr.bf16.mxu0 %v1831_v0  ;;  %1455 = vmatpush3.bf16.msra.mxu1 %v1633_v16  ;;  %v1659_v16 = vld [vmem:[%s2225_s6 + $0x30] sm:$0xff]  }
  0x85   : > { %1456 = vmatprep.subr.bf16.mxu1 %v1831_v0 }
  0x87   : > { %1481 = vmatpush3.bf16.msra.mxu0 %v1636_v17  ;;  %v1660_v17 = vld [vmem:[%s2225_s6 + $0x28] sm:$0xff]  }
  0x88   : > { %1482 = vmatprep.subr.bf16.mxu0 %v1831_v0  ;;  %1457 = vmatpush3.bf16.msra.mxu1 %v1635_v18  ;;  %v1661_v18 = vld [vmem:[%s2225_s6 + $0x20] sm:$0xff]  }
  0x89   : > { %1458 = vmatprep.subr.bf16.mxu1 %v1831_v0 }
  0x8b   : > { %1483 = vmatpush3.bf16.msra.mxu0 %v1638_v19  ;;  %v1662_v19 = vld [vmem:[%s2225_s6 + $0x18] sm:$0xff]  }
  0x8c   : > { %1494 = vmatprep.subr.bf16.mxu0 %v1831_v0  ;;  %1459 = vmatpush3.bf16.msra.mxu1 %v1637_v20  ;;  %v1663_v20 = vld [vmem:[%s2225_s6 + $0x10] sm:$0xff]  }
  0x8d   : > { %1460 = vmatprep.subr.bf16.mxu1 %v1831_v0 }
  0x8e   : > { %1485 = vmatmul.mubr.bf16.vlgmr.msra.gmra.mxu0 %v1623_v8 }
  0x8f   : > { %1510 = vmatprep.mubr.msk.bf16.mxu0 %vm1832_vm0, %v1831_v0  ;;  %1495 = vmatpush3.bf16.msra.mxu0 %v1650_v36 }
  0x90   : > { %1461 = vmatpush3.bf16.msra.mxu1 %v1639_v21  ;;  %1496 = vmatprep.subr.bf16.mxu0 %v1831_v0  ;;  %v1664_v21 = vld [vmem:[%s2225_s6 + $0x8] sm:$0xff]  }
  0x91   : > { %1462 = vmatprep.subr.bf16.mxu1 %v1831_v0 }
  0x93   : > { %1497 = vmatpush3.bf16.msra.mxu0 %v1651_v37 }
  0x94   : > { %1463 = vmatpush3.bf16.msra.mxu1 %v1640_v22  ;;  %1498 = vmatprep.subr.bf16.mxu0 %v1831_v0  ;;  %v1665_v22 = vld [vmem:[%s2225_s6] sm:$0xff]  }
  0x95   : > { %1488 = vmatprep.subr.bf16.mxu1 %v1831_v0 }
  0x97   : > { %1499 = vmatpush3.bf16.msra.mxu0 %v1652_v38 }
  0x98   : > { %1500 = vmatprep.subr.bf16.mxu0 %v1831_v0 }
  0x9b   : > { %1501 = vmatpush3.bf16.msra.mxu0 %v1653_v39 }
  0x9c   : > { %1502 = vmatprep.subr.bf16.mxu0 %v1831_v0 }
  0x9f   : > { %1503 = vmatpush3.bf16.msra.mxu0 %v1654_v40 }
  0xa0   : > { %1504 = vmatprep.subr.bf16.mxu0 %v1831_v0 }
  0xa3   : > { %1505 = vmatpush3.bf16.msra.mxu0 %v1655_v41 }
  0xa4   : > { %1506 = vmatprep.subr.bf16.mxu0 %v1831_v0 }
  0xa7   : > { %1507 = vmatpush3.bf16.msra.mxu0 %v1656_v63 }
  0xa8   : > { %1508 = vmatprep.subr.bf16.mxu0 %v1831_v0 }
  0xab   : > { %1509 = vmatpush3.bf16.msra.mxu0 %v1657_v1 }
  0xac   : > { %1534 = vmatprep.subr.bf16.mxu0 %v1831_v0 }
  0xed   : > { %v2106_v23 = vpop.permute.xlu0 %486 }
  0xf1   : > { %v2108_v26 = vpop.permute.xlu0 %491 }
 0x137   : > { %v477_v24 = vpop.f32.mrf.mxu1 }
 0x138   : > { %v494_v28 = vmul.f32 %v2106_v23, %v477_v24 }
 0x139   : > { %v1446_v25 = vpop.f32.mrf.mxu1 }
 0x13a   : > { %v1357_v25 = vld [vmem:[%s2224_s5 + $0x1] ss:$0 sm:$0xff] }
 0x13b   : > { %v480_v27 = vpop.f32.mrf.mxu1 }
 0x13c   : > { %v495_v29 = vmul.f32 %v2108_v26, %v480_v27 }
 0x13d   : > { %v1447_v30 = vpop.f32.mrf.mxu1 }
 0x13e   : > { %v528_v31 = vpack.c.bf16 %v495_v29, %v494_v28 }
 0x140   : > { %1465 = vmatmul.mubr.bf16.vlgmr.msra.gmra.mxu1 %v528_v31 }
 0x141   : > { %1490 = vmatprep.mubr.msk.bf16.mxu1 %vm1832_vm0, %v1831_v0 }
 0x14e   : > { %v700_v32 = vpop.f32.mrf.mxu0 }
 0x150   : > { %v1486_v33 = vpop.f32.mrf.mxu0 }
 0x152   : > { %v703_v34 = vpop.f32.mrf.mxu0 }
 0x154   : > { %v1487_v35 = vpop.f32.mrf.mxu0 }
 0x200   : > { %v611_v42 = vpop.f32.mrf.mxu1 }
 0x201   : > { %v701_v43 = vadd.f32 %v700_v32, %v611_v42  ;;  %v1022_v32 = vpop.permute.xlu1 %1021 }
 0x202   : > { %v1466_v45 = vpop.f32.mrf.mxu1 }
 0x203   : > { %v714_v47 = vadd.f32 %v1335_v44, %v701_v43 }
 0x204   : > { %v614_v46 = vpop.f32.mrf.mxu1 }
 0x205   : > { %v704_v48 = vadd.f32 %v703_v34, %v614_v46  ;;  %v716_v51 = vmax.f32 %v714_v47, 0.0  ;;  %v1027_v37 = vpop.permute.xlu1 %1026 }
 0x206   : > { %v1467_v49 = vpop.f32.mrf.mxu1 }
 0x207   : > { %v715_v50 = vadd.f32 %v1335_v44, %v704_v48  ;;  %v1144_v48 = vlaneseq }
 0x209   : > { %v717_v52 = vmax.f32 %v715_v50, 0.0  ;;  %v1145_v49 = vand.u32 127, %v1144_v48  ;;  %v1055_v50 = vld [vmem:[%s2226_s7] sm:$0x1] }
 0x20b   : > { %v1382_v53 = vpack.c.bf16 %v717_v52, %v716_v51  ;;  %vm1146_vm2 = vcmp.lt.s32.totalorder %v1145_v49, 4 }
 0x20d   : > { %1383 = vst [vmem:[#allocation2] sm:$0xff] %v1382_v53  }
 0x214   : > { %v1641_v54 = vld [vmem:[#allocation2] sm:$0xff]  }
 0x215   : > { %1489 = vmatpush3.bf16.msra.mxu1 %v1641_v54 }
 0x216   : > { %1514 = vmatprep.subr.bf16.mxu1 %v1831_v0 }
 0x218   : > { %1491 = vmatmul.mubr.msk.bf16.vlgmr.msra.gmra.mxu1 %vm439_vm1, %v2082_v9 }
 0x219   : > { %1515 = vmatpush3.bf16.msra.mxu1 %v1642_v55  ;;  %1530 = vmatprep.mubr.msk.bf16.mxu1 %vm1832_vm0, %v1831_v0 }
 0x21a   : > { %1516 = vmatprep.subr.bf16.mxu1 %v1831_v0 }
 0x21d   : > { %1517 = vmatpush3.bf16.msra.mxu1 %v1643_v56 }
 0x21e   : > { %1518 = vmatprep.subr.bf16.mxu1 %v1831_v0 }
 0x221   : > { %1519 = vmatpush3.bf16.msra.mxu1 %v1644_v57 }
 0x222   : > { %1520 = vmatprep.subr.bf16.mxu1 %v1831_v0 }
 0x225   : > { %1521 = vmatpush3.bf16.msra.mxu1 %v1645_v58 }
 0x226   : > { %1522 = vmatprep.subr.bf16.mxu1 %v1831_v0 }
 0x229   : > { %1523 = vmatpush3.bf16.msra.mxu1 %v1646_v59 }
 0x22a   : > { %1524 = vmatprep.subr.bf16.mxu1 %v1831_v0 }
 0x22d   : > { %1525 = vmatpush3.bf16.msra.mxu1 %v1647_v60 }
 0x22e   : > { %1526 = vmatprep.subr.bf16.mxu1 %v1831_v0 }
 0x231   : > { %1527 = vmatpush3.bf16.msra.mxu1 %v1648_v61 }
 0x232   : > { %1528 = vmatprep.subr.bf16.mxu1 %v1831_v0 }
 0x235   : > { %1529 = vmatpush3.bf16.msra.mxu1 %v1649_v62 }
 0x238   : > { %1531 = vmatmul.mubr.bf16.vlgmr.msra.gmra.mxu1 %v1641_v54 }
 0x2d8   : > { %v770_v4 = vpop.f32.mrf.mxu1 }
 0x2d9   : > { %v777_v7 = vmul.f32 %v770_v4, %v2106_v23 }
 0x2da   : > { %v1492_v5 = vpop.f32.mrf.mxu1 }
 0x2dc   : > { %v773_v6 = vpop.f32.mrf.mxu1 }
 0x2dd   : > { %v778_v8 = vmul.f32 %v773_v6, %v2108_v26 }
 0x2de   : > { %v1493_v9 = vpop.f32.mrf.mxu1 }
 0x2df   : > { %v812_v10 = vpack.c.bf16 %v778_v8, %v777_v7 }
 0x2e1   : > { %1511 = vmatmul.mubr.bf16.vlgmr.msra.gmra.mxu0 %v812_v10 }
 0x2e2   : > { %1550 = vmatprep.mubr.msk.bf16.mxu0 %vm1832_vm0, %v1831_v0  ;;  %1535 = vmatpush3.bf16.msra.mxu0 %v1658_v15 }
 0x2e3   : > { %1536 = vmatprep.subr.bf16.mxu0 %v1831_v0 }
 0x2e6   : > { %1537 = vmatpush3.bf16.msra.mxu0 %v1659_v16 }
 0x2e7   : > { %1538 = vmatprep.subr.bf16.mxu0 %v1831_v0 }
 0x2ea   : > { %1539 = vmatpush3.bf16.msra.mxu0 %v1660_v17 }
 0x2eb   : > { %1540 = vmatprep.subr.bf16.mxu0 %v1831_v0 }
 0x2ee   : > { %1541 = vmatpush3.bf16.msra.mxu0 %v1661_v18 }
 0x2ef   : > { %1542 = vmatprep.subr.bf16.mxu0 %v1831_v0 }
 0x2f2   : > { %1543 = vmatpush3.bf16.msra.mxu0 %v1662_v19 }
 0x2f3   : > { %1544 = vmatprep.subr.bf16.mxu0 %v1831_v0 }
 0x2f6   : > { %1545 = vmatpush3.bf16.msra.mxu0 %v1663_v20 }
 0x2f7   : > { %1546 = vmatprep.subr.bf16.mxu0 %v1831_v0 }
 0x2f8   : > { %v984_v11 = vpop.f32.mrf.mxu1 }
 0x2fa   : > { %v1532_v12 = vpop.f32.mrf.mxu1  ;;  %1547 = vmatpush3.bf16.msra.mxu0 %v1664_v21 }
 0x2fb   : > { %1548 = vmatprep.subr.bf16.mxu0 %v1831_v0 }
 0x2fc   : > { %v987_v13 = vpop.f32.mrf.mxu1 }
 0x2fe   : > { %v1533_v14 = vpop.f32.mrf.mxu1  ;;  %1549 = vmatpush3.bf16.msra.mxu0 %v1665_v22 }
 0x3a1   : > { %v895_v23 = vpop.f32.mrf.mxu0 }
 0x3a2   : > { %v985_v24 = vadd.f32 %v984_v11, %v895_v23 }
 0x3a3   : > { %v1512_v26 = vpop.f32.mrf.mxu0 }
 0x3a4   : > { %v999_v28 = vadd.f32 %v1357_v25, %v985_v24 }
 0x3a5   : > { %v898_v27 = vpop.f32.mrf.mxu0 }
 0x3a6   : > { %v988_v29 = vadd.f32 %v987_v13, %v898_v27  ;;  %v1001_v33 = vmax.f32 %v999_v28, 0.0 }
 0x3a7   : > { %v1513_v30 = vpop.f32.mrf.mxu0 }
 0x3a8   : > { %v1000_v31 = vadd.f32 %v1357_v25, %v988_v29 }
 0x3aa   : > { %v1002_v0 = vmax.f32 %v1000_v31, 0.0 }
 0x3ac   : > { %v1387_v34 = vpack.c.bf16 %v1002_v0, %v1001_v33 }
 0x3ae   : > { %1388 = vst [vmem:[#allocation2] sm:$0xff] %v1387_v34   ;;  %v1391_v35 = vunpack.c.l.bf16 %v1387_v34  ;;  %v1392_v36 = vunpack.c.h.bf16 %v1387_v34 }
 0x3b0   : > { %v1029_v38 = vmul.f32 %v1391_v35, %v1022_v32  ;;  %v1030_v39 = vmul.f32 %v1392_v36, %v1027_v37 }
 0x3b2   : > { %v1031_v40 = vadd.f32 %v1030_v39, %v1029_v38 }
 0x3b4   : > { %v1032_v41 = vrot.slane %v1031_v40, 4 }
 0x3b6   : > { %v1033_v42 = vadd.f32 %v1032_v41, %v1031_v40 }
 0x3b8   : > { %v1034_v43 = vrot.slane %v1033_v42, 2 }
 0x3ba   : > { %v1035_v44 = vadd.f32 %v1034_v43, %v1033_v42 }
 0x3bc   : > { %v1036_v45 = vrot.slane %v1035_v44, 1 }
 0x3be   : > { %v1037_v46 = vadd.f32 %v1036_v45, %v1035_v44 }
 0x3c0   : > { %v1038_v47 = vpack.c.bf16 %v1037_v46, %v1037_v46 }
 0x3c2   : > { %1551 = vmatmul.mubr.bf16.vlgmr.msra.gmra.mxu0 %v1038_v47 }
 0x482   : > { %v1138_v51 = vpop.f32.mrf.mxu0 }
 0x483   : > { %v1139_v52 = vadd.f32 %v1138_v51, %v1055_v50 }
 0x484   : > { %v1552_v53 = vpop.f32.mrf.mxu0 }
 0x485   : > { %v1147_v54 = vsel %vm1146_vm2, %v1139_v52, -1e+30 }
 0x486   : > { %v1141_v55 = vpop.f32.mrf.mxu0  ;;  %v1149_v56 = vsel %vm1148_vm3, %v1147_v54, -inf }
 0x487   : > { %1150 = vmax.xlane.f32.xlu0 %v1149_v56 }
 0x488   : > { %v1553_v57 = vpop.f32.mrf.mxu0 }
 0x510   : > { %v1151_v58 = vpop.xlane.xlu0 %1150 }
 0x511   : > { %v1152_v59 = vsub.f32 %v1147_v54, %v1151_v58 }
 0x513   : > { %v1153_v60 = vmul.f32 1.442695, %v1152_v59 }
 0x515   : > { %1666 = vpow2.f32 %v1153_v60 }
 0x522   : > { %v1667_v61 = vpop.eup %1666 }
 0x523   : > { %v1155_v62 = vsel %vm1148_vm3, %v1667_v61, 0.0 }
 0x524   : > { %1156 = vadd.xlane.f32.xlu1 %v1155_v62 }
 0x5ad   : > { %v1157_v63 = vpop.xlane.xlu1 %1156 }
 0x5ae   : > { %1668 = vlog2.f32 %v1157_v63 }
 0x5bb   : > { %v1669_v1 = vpop.eup %1668 }
 0x5bc   : > { %v1159_v2 = vmul.f32 0.6931472, %v1669_v1 }
 0x5be   : > { %v1160_v3 = vadd.f32 %v1159_v2, %v1151_v58 }
 0x5c0   : > { %v1161_v4 = vsub.f32 %v1147_v54, %v1160_v3 }
 0x5c2   : > { %1162 = vst [vmem:[%s406_s20] sm:$0x1] %v1161_v4 }
 0x5c3   : > { %1765 = shalt.err (!%p1762_p1)
}
 0x5c4   : > { %s1766_s12 = scalar_lea.hbm %s1174_s23, 16  ;;  %s1770_s18 = scalar_lea.hbm %s2227_s8, 32 }
 0x5c5   : > { %p1767_p4 = scmp.ne.s32.totalorder %s1174_s23, %s1766_s12  ;;  %p1771_p8 = scmp.lt.s32.totalorder %s1174_s23, %s2227_s8 }
 0x5c6   : > { %p1772_p11 = scmp.lt.s32.totalorder %s1770_s18, %s1766_s12 }
 0x5c7   : > { %p1768_p3 = pnand %p1767_p4, %p2261_p12 }
 0x5c8   : > { %p1773_p6 = por %p1772_p11, %p1771_p8 }
 0x5c9   : > { %p1769_p7 = pneg %p1768_p3 }
 0x5cb   : > { %p1774_p9 = pnand %p1773_p6, %p1769_p7 }
 0x5cd   : > { %1777 = shalt.err (!%p1774_p9)
}
 0x5ce   : > { %1562 = dma.vmem_to_hbm [thread:$0]  (%p2261_p12), %s1177_s27, 16, %s1174_s23, %s1164_s13  }
 0x5cf PF: > { %s2262_s10 = sld [smem:[#allocation14_spill]]  ;;  %p2265_p0 = scmp.ge.s32.totalorder %s1824_s30, 2 }
 0x5d0   : > { %s2263_s14 = sld [smem:[#allocation16_spill]] }
 0x5d5   : > { %s1188_s16 = sand.u32 1, %s2262_s10  }
 0x5d6   : > { %p2264_p13 = scmp.ne.s32.totalorder %s2263_s14, 0  ;;  %s1189_s15 = scalar_lea.sflag [#allocation5], %s1188_s16 }
 0x5d8   : > { %p1576_p5 = pnand %p2265_p0, %p2264_p13 }
 0x5da   : > { %p1577_p2 = pneg %p1576_p5 }
 0x5dc   : > { %1807 = dma.done.wait (%p1577_p2), %s1189_s15, 16  }
 0x5dd   : > { %1809 = vsyncadd (%p1577_p2), %s1189_s15, 4294967280  ;;  %s2266_s30 = sld [smem:[#allocation17_spill]]  ;;  %s2269_s27 = smov %s1816_s28 }
 0x5de   : > { %s2267_s19 = sld [smem:[#allocation15_spill]] }
 0x5df   : > { %s2268_s29 = sld [smem:[#allocation18_spill]] }
 0x5e3   : > { %p24_p10 = scmp.ge.s32.totalorder %s2266_s30, 4  }
 0x5e4   : > { %s2270_s28 = smov %s2267_s19 }
 0x5e5   :  { %26 = sbr.rel (!%p24_p10) target bundleno = 10 (0xa), region = 122 }
 0x5ea   :  { %1193 = vsyncpa [#allocation4], 1 }
 0x5eb   :  { %1195 = vsyncpa [#allocation4 + $0x1], 1 }
 0x5ec   :  { %1196 = vsyncpa [#allocation7], 1 }
 0x5ed   :  { %1198 = vsyncpa [#allocation7 + $0x1], 1 }
 0x5ee   :  { %1199 = vsyncpa [#allocation5], 1 }
 0x5ef   :  { %1201 = vsyncpa [#allocation5 + $0x1], 1 }

</bundles_post_ra>
